<compile_context>
chip_gen: v7x
topology: tpu7x:2x2x1
jax: 0.10.0
libtpu: 0.0.40
codegen_flags: <defaults>
</compile_context>

<pallas_src>
import functools

import jax
import jax.numpy as jnp
from jax.experimental import pallas as pl
from jax.experimental.pallas import tpu as pltpu


INPUT_SIZE = 784          # the module hard-codes xb.reshape(-1, 784)
MIN_GRID_STEPS = 4        # keep DMA/compute overlap + both v7x TensorCores busy


def _round_up(x, m):
    return (x + m - 1) // m * m


def _mlp_kernel(x_ref, w1_ref, b1_ref, w2_ref, b2_ref, o_ref):
    """One batch tile: out = relu(relu(x @ W1 + b1) @ W2 + b2), bf16 out."""
    x = x_ref[...].astype(jnp.bfloat16)                      # cast after DMA (VPU)
    h = jnp.dot(x, w1_ref[...], preferred_element_type=jnp.float32)
    h = jnp.maximum(h + b1_ref[...], 0.0)                    # f32 epilogue
    o = jnp.dot(h.astype(jnp.bfloat16), w2_ref[...],
                preferred_element_type=jnp.float32)
    o = jnp.maximum(o + b2_ref[...], 0.0)                    # final activation
    o_ref[...] = o.astype(o_ref.dtype)                       # bf16 store


def prepare_params(w1, b1, w2, b2):
    """Pad / cast parameters once, outside the per-step forward.

    w1: (784, H), b1: (H,), w2: (H, O), b2: (O,) -- x @ W convention
    (PyTorch Linear weights transposed).  Weights -> bf16 padded to
    lane-friendly shapes (128, never 256); biases -> f32 rows (1, N_pad).
    """
    K, H = w1.shape
    O = w2.shape[1]
    H_pad = _round_up(H, 128)
    O_pad = _round_up(O, 128)

    w1_p = jnp.zeros((K, H_pad), jnp.bfloat16).at[:, :H].set(
        w1.astype(jnp.bfloat16))
    b1_p = jnp.zeros((1, H_pad), jnp.float32).at[0, :H].set(
        b1.astype(jnp.float32))
    w2_p = jnp.zeros((H_pad, O_pad), jnp.bfloat16).at[:H, :O].set(
        w2.astype(jnp.bfloat16))
    b2_p = jnp.zeros((1, O_pad), jnp.float32).at[0, :O].set(
        b2.astype(jnp.float32))
    return w1_p, b1_p, w2_p, b2_p


def _choose_tile(B_pad, tile_b):
    """Batch tile: multiple of 8, <= tile_b, and small enough that the grid
    has >= MIN_GRID_STEPS steps whenever the batch allows it."""
    tb_cap = _round_up(pl.cdiv(B_pad, MIN_GRID_STEPS), 8)
    tb = max(8, min(tile_b, tb_cap))
    return tb


@functools.partial(jax.jit, static_argnames=("out_features", "tile_b"))
def audio_mnist_forward(x, w1_p, b1_p, w2_p, b2_p, *, out_features,
                        tile_b=2048):
    """x: anything reshapeable to (-1, 784); DMA'd in its own dtype
    (hand in bf16 for best HBM bandwidth).  Returns (B, out_features) bf16
    logits; upcast outside only if f32 logits are required."""
    xb = x.reshape(-1, INPUT_SIZE)           # NO forced f32 upcast
    if xb.dtype == jnp.float64:
        xb = xb.astype(jnp.float32)
    B = xb.shape[0]
    K = INPUT_SIZE
    H_pad = w1_p.shape[1]
    O_pad = w2_p.shape[1]

    # Pad batch to a multiple of the tile so every grid step is a full tile
    # (padded rows are zeros -> no garbage/NaN ever enters the pipeline).
    B8 = _round_up(max(B, 8), 8)
    tb = _choose_tile(B8, tile_b)
    B_pad = _round_up(B8, tb)
    if B_pad != B:
        xb = jnp.pad(xb, ((0, B_pad - B), (0, 0)))

    grid = (B_pad // tb,)

    x_bytes = B_pad * K * xb.dtype.itemsize
    flops = 2 * B_pad * (K * H_pad + H_pad * O_pad)
    bytes_accessed = (x_bytes                       # x (native dtype)
                      + K * H_pad * 2               # w1 (bf16)
                      + H_pad * 4                   # b1 (f32)
                      + H_pad * O_pad * 2           # w2 (bf16)
                      + O_pad * 4                   # b2 (f32)
                      + B_pad * O_pad * 2)          # out (bf16)

    # VMEM per step (double-buffered x at 896 lanes after 784->896 rounding):
    #   2 * tb * 896 * itemsize + 2 * tb * 128 * 2 + weights (~0.25 MB)
    # tb=2048, bf16 x -> ~8.4 MB; f32 x -> ~15.7 MB.  Well under 48 MB.
    out_p = pl.pallas_call(
        _mlp_kernel,
        out_shape=jax.ShapeDtypeStruct((B_pad, O_pad), jnp.bfloat16),
        grid=grid,
        in_specs=[
            # Batch-tiled activations: default double-buffering overlaps the
            # x DMA with the MXU (no deeper pl.Buffered needed; BW-limited).
            pl.BlockSpec((tb, K), lambda i: (i, 0)),
            # Weights / biases: same block every step -> stay VMEM-resident.
            pl.BlockSpec((K, H_pad), lambda i: (0, 0)),
            pl.BlockSpec((1, H_pad), lambda i: (0, 0)),
            pl.BlockSpec((H_pad, O_pad), lambda i: (0, 0)),
            pl.BlockSpec((1, O_pad), lambda i: (0, 0)),
        ],
        out_specs=pl.BlockSpec((tb, O_pad), lambda i: (i, 0)),
        compiler_params=pltpu.CompilerParams(
            dimension_semantics=("parallel",),     # batch tiles independent
            vmem_limit_bytes=48 * 1024 * 1024),    # v5e default is only 16 MiB
        cost_estimate=pl.CostEstimate(
            flops=flops, transcendentals=0, bytes_accessed=bytes_accessed),
    )(xb, w1_p, b1_p, w2_p, b2_p)

    # Cheap lazy slice of bf16 logits; callers that can consume the padded
    # (B_pad, 128) buffer directly (masked argmax/loss) should do so instead.
    return out_p[:B, :out_features]


def init_params(key, input_size=784, hidden_size=128, output_size=10):
    """Xavier-normal weights, PyTorch Linear default uniform biases,
    stored as (in, out) for x @ W."""
    k1, k2, k3, k4 = jax.random.split(key, 4)
    std1 = (2.0 / (input_size + hidden_size)) ** 0.5
    std2 = (2.0 / (hidden_size + output_size)) ** 0.5
    w1 = jax.random.normal(k1, (input_size, hidden_size), jnp.float32) * std1
    w2 = jax.random.normal(k2, (hidden_size, output_size), jnp.float32) * std2
    bound1 = 1.0 / (input_size ** 0.5)
    bound2 = 1.0 / (hidden_size ** 0.5)
    b1 = jax.random.uniform(k3, (hidden_size,), jnp.float32, -bound1, bound1)
    b2 = jax.random.uniform(k4, (output_size,), jnp.float32, -bound2, bound2)
    return w1, b1, w2, b2


def _reference_bf16(x, w1, b1, w2, b2):
    """Same math as the kernel (bf16 matmul inputs, f32 accumulate)."""
    xb = x.reshape(-1, INPUT_SIZE).astype(jnp.bfloat16)
    h = jnp.dot(xb, w1.astype(jnp.bfloat16),
                preferred_element_type=jnp.float32) + b1
    h = jnp.maximum(h, 0.0)
    o = jnp.dot(h.astype(jnp.bfloat16), w2.astype(jnp.bfloat16),
                preferred_element_type=jnp.float32) + b2
    return jnp.maximum(o, 0.0)


def _reference_f32(x, w1, b1, w2, b2):
    xb = x.reshape(-1, INPUT_SIZE).astype(jnp.float32)
    h = jnp.maximum(xb @ w1 + b1, 0.0)
    return jnp.maximum(h @ w2 + b2, 0.0)


if __name__ == "__main__":
    key = jax.random.PRNGKey(0)
    kx, kx2, kp = jax.random.split(key, 3)

    B, hidden_size, output_size = 2, 128, 10
    # Caller hands in bf16 activations (cast once at data-prep time).
    x_f32 = jax.random.normal(kx, (B, 1, 28, 28), jnp.float32)
    x = x_f32.astype(jnp.bfloat16)

    w1, b1, w2, b2 = init_params(kp, INPUT_SIZE, hidden_size, output_size)
    params = prepare_params(w1, b1, w2, b2)   # pad/cast once, outside forward

    out = audio_mnist_forward(x, *params, out_features=output_size)
    out = jax.block_until_ready(out)
    assert out.shape == (B, output_size), out.shape
    assert out.dtype == jnp.bfloat16, out.dtype

    out_f32 = out.astype(jnp.float32)
    ref_bf16 = _reference_bf16(x, w1, b1, w2, b2)
    assert jnp.allclose(out_f32, ref_bf16, atol=3e-2, rtol=2e-2), \
        "bf16 ref mismatch"
    ref_f32 = _reference_f32(x, w1, b1, w2, b2)
    assert jnp.allclose(out_f32, ref_f32, atol=8e-2, rtol=8e-2), \
        "f32 ref mismatch"

    # Multi-tile grid (B=40, tile_b=16 -> 3 grid steps after padding to 48),
    # fed with f32 input to exercise the in-kernel cast path as well.
    B2 = 40
    x2 = jax.random.normal(kx2, (B2, 1, 28, 28), jnp.float32)
    out2 = jax.block_until_ready(
        audio_mnist_forward(x2, *params, out_features=output_size, tile_b=16))
    assert out2.shape == (B2, output_size), out2.shape
    ref2 = _reference_bf16(x2.astype(jnp.bfloat16), w1, b1, w2, b2)
    assert jnp.allclose(out2.astype(jnp.float32), ref2,
                        atol=3e-2, rtol=2e-2), "tiled ref mismatch"

    print("KERNEL_OK")
</pallas_src>

<mosaic_0001>
module attributes {stable_mosaic.version = 11 : i64} {
  func.func @_mlp_kernel(%arg0: i32, %arg1: memref<8x784xbf16, #tpu.memory_space<vmem>>, %arg2: memref<784x128xbf16, #tpu.memory_space<vmem>>, %arg3: memref<1x128xf32, #tpu.memory_space<vmem>>, %arg4: memref<128x128xbf16, #tpu.memory_space<vmem>>, %arg5: memref<1x128xf32, #tpu.memory_space<vmem>>, %arg6: memref<8x128xbf16, #tpu.memory_space<vmem>>) attributes {dimension_semantics = [#tpu.dimension_semantics<parallel>], iteration_bounds = array<i64: 1>, scalar_prefetch = 0 : i64, scratch_operands = 0 : i64, tpu.core_type = #tpu.core_type<tc>, window_params = [{transform_indices = @transform_0, window_bounds = array<i64: 8, 784>}, {pipeline_mode = #tpu.pipeline_mode<synchronous>, transform_indices = @transform_1, window_bounds = array<i64: 784, 128>}, {pipeline_mode = #tpu.pipeline_mode<synchronous>, transform_indices = @transform_2, window_bounds = array<i64: 1, 128>}, {pipeline_mode = #tpu.pipeline_mode<synchronous>, transform_indices = @transform_3, window_bounds = array<i64: 128, 128>}, {pipeline_mode = #tpu.pipeline_mode<synchronous>, transform_indices = @transform_4, window_bounds = array<i64: 1, 128>}, {transform_indices = @transform_5, window_bounds = array<i64: 8, 128>}]} {
    %c0 = arith.constant 0 : index
    %c0_0 = arith.constant 0 : index
    %0 = vector.load %arg1[%c0, %c0_0] : memref<8x784xbf16, #tpu.memory_space<vmem>>, vector<8x784xbf16>
    %c0_1 = arith.constant 0 : index
    %c0_2 = arith.constant 0 : index
    %1 = vector.load %arg2[%c0_1, %c0_2] : memref<784x128xbf16, #tpu.memory_space<vmem>>, vector<784x128xbf16>
    %cst = arith.constant dense<0.000000e+00> : vector<8x128xf32>
    %2 = tpu.matmul %0, %1, %cst {dimension_numbers = #tpu.dot_dimension_numbers<[1], [0], [0], [1], [0, 0, 1, 1], [], []>} : vector<8x784xbf16>, vector<784x128xbf16>, vector<8x128xf32> -> vector<8x128xf32>
    %c0_3 = arith.constant 0 : index
    %c0_4 = arith.constant 0 : index
    %3 = vector.load %arg3[%c0_3, %c0_4] : memref<1x128xf32, #tpu.memory_space<vmem>>, vector<1x128xf32>
    %4 = vector.broadcast %3 : vector<1x128xf32> to vector<8x128xf32>
    %5 = arith.addf %2, %4 : vector<8x128xf32>
    %cst_5 = arith.constant 0.000000e+00 : f32
    %6 = vector.broadcast %cst_5 : f32 to vector<8x128xf32>
    %7 = arith.maximumf %5, %6 : vector<8x128xf32>
    %8 = arith.truncf %7 : vector<8x128xf32> to vector<8x128xbf16>
    %c0_6 = arith.constant 0 : index
    %c0_7 = arith.constant 0 : index
    %9 = vector.load %arg4[%c0_6, %c0_7] : memref<128x128xbf16, #tpu.memory_space<vmem>>, vector<128x128xbf16>
    %cst_8 = arith.constant dense<0.000000e+00> : vector<8x128xf32>
    %10 = tpu.matmul %8, %9, %cst_8 {dimension_numbers = #tpu.dot_dimension_numbers<[1], [0], [0], [1], [0, 0, 1, 1], [], []>} : vector<8x128xbf16>, vector<128x128xbf16>, vector<8x128xf32> -> vector<8x128xf32>
    %c0_9 = arith.constant 0 : index
    %c0_10 = arith.constant 0 : index
    %11 = vector.load %arg5[%c0_9, %c0_10] : memref<1x128xf32, #tpu.memory_space<vmem>>, vector<1x128xf32>
    %12 = vector.broadcast %11 : vector<1x128xf32> to vector<8x128xf32>
    %13 = arith.addf %10, %12 : vector<8x128xf32>
    %cst_11 = arith.constant 0.000000e+00 : f32
    %14 = vector.broadcast %cst_11 : f32 to vector<8x128xf32>
    %15 = arith.maximumf %13, %14 : vector<8x128xf32>
    %16 = arith.truncf %15 : vector<8x128xf32> to vector<8x128xbf16>
    %c0_12 = arith.constant 0 : index
    %c0_13 = arith.constant 0 : index
    %17 = vector.load %arg6[%c0_12, %c0_13] : memref<8x128xbf16, #tpu.memory_space<vmem>>, vector<8x128xbf16>
    tpu.vector_store %arg6[%c0_12, %c0_13], %16 {strides = array<i32>} : memref<8x128xbf16, #tpu.memory_space<vmem>>, vector<8x128xbf16>,
    return
  }
  func.func @transform_0(%arg0: i32) -> (i32, i32) {
    %c0_i32 = arith.constant 0 : i32
    %c0_i32_0 = arith.constant 0 : i32
    return %arg0, %c0_i32 : i32, i32
  }
  func.func @transform_1(%arg0: i32) -> (i32, i32) {
    %c0_i32 = arith.constant 0 : i32
    %c0_i32_0 = arith.constant 0 : i32
    %c0_i32_1 = arith.constant 0 : i32
    return %c0_i32, %c0_i32_0 : i32, i32
  }
  func.func @transform_2(%arg0: i32) -> (i32, i32) {
    %c0_i32 = arith.constant 0 : i32
    %c0_i32_0 = arith.constant 0 : i32
    %c0_i32_1 = arith.constant 0 : i32
    return %c0_i32, %c0_i32_0 : i32, i32
  }
  func.func @transform_3(%arg0: i32) -> (i32, i32) {
    %c0_i32 = arith.constant 0 : i32
    %c0_i32_0 = arith.constant 0 : i32
    %c0_i32_1 = arith.constant 0 : i32
    return %c0_i32, %c0_i32_0 : i32, i32
  }
  func.func @transform_4(%arg0: i32) -> (i32, i32) {
    %c0_i32 = arith.constant 0 : i32
    %c0_i32_0 = arith.constant 0 : i32
    %c0_i32_1 = arith.constant 0 : i32
    return %c0_i32, %c0_i32_0 : i32, i32
  }
  func.func @transform_5(%arg0: i32) -> (i32, i32) {
    %c0_i32 = arith.constant 0 : i32
    %c0_i32_0 = arith.constant 0 : i32
    return %arg0, %c0_i32 : i32, i32
  }
}

</mosaic_0001>

<bundles_post_ra>
// kernel: audio_mnist_forward.1
= control target key start
LH: loop header
LB: loop body
LE: loop exit
PB: predicated region body
PF: predicated region fallthrough
CT: control target
= control target key end

     0   :  { %10 = vsyncpa [#allocation3], 0  ;;  %s1010_s18 = smov [#allocation2]   ;;  %s1104_s0 = inlined_call_operand.vmem [shape: bf16[8,784], index: 0, kind: input, shape index: {}]   ;;  %s1105_s1 = inlined_call_operand.hbm [shape: bf16[784,128], index: 1, kind: input, shape index: {}]   ;;  %s1106_s2 = inlined_call_operand.vmem [shape: f32[1,128], index: 2, kind: input, shape index: {}]   ;;  %s1107_s3 = inlined_call_operand.vmem [shape: bf16[128,128], index: 3, kind: input, shape index: {}]   ;;  %s1108_s4 = inlined_call_operand.vmem [shape: f32[1,128], index: 4, kind: input, shape index: {}]   ;;  %s1109_s5 = inlined_call_operand.vmem [shape: bf16[8,128], index: 5, kind: output, shape index: {}]  }
   0x1   :  { %s18_s19 = sshll.u32 %s1010_s18, 4  ;;  %s986_s22 = scalar_lea.hbm %s1105_s1, 6272  ;;  %s19_s19 = int_to_ptr.vmem [resolvable:$true] %s18_s19 }
   0x2   :  { %p987_p0 = scmp.ne.s32.totalorder %s1105_s1, %s986_s22  ;;  %p990_p1 = scmp.lt.u32.totalorder %s986_s22, %s1105_s1 }
   0x4   :  { %p992_p2 = pnand %p990_p1, %p987_p0 }
   0x6   :  { %995 = shalt.err (!%p992_p2)
}
   0x7   :  { %s996_s27 = scalar_lea.vmem %s19_s19, 6272  ;;  %p1001_p4 = scmp.lt.s32.totalorder %s19_s19, %s19_s19 }
   0x8   :  { %p997_p3 = scmp.ne.s32.totalorder %s19_s19, %s996_s27  ;;  %p1002_p5 = scmp.lt.s32.totalorder %s996_s27, %s996_s27 }
   0xa   :  { %p1003_p6 = por %p1002_p5, %p1001_p4 }
   0xc   :  { %p1004_p7 = pnand %p1003_p6, %p997_p3 }
   0xe   :  { %1007 = shalt.err (!%p1004_p7)
}
   0xf   :  { %s1011_s28 = smov 64   ;;  %s1012_s29 = smov 4  }
  0x10   :  { %24 = dma.hbm_to_vmem [thread:$0]  %s1105_s1, 6272, %s19_s19, [#allocation3], %s1011_s28, %s1011_s28, %s1012_s29  }
  0x11   :  { %1008 = dma.done.wait [#allocation3], 6272  }
  0x12   :  { %1009 = vsyncadd [#allocation3], 4294961024  ;;  %v922_v0 = vld [vmem:[#allocation2 + $0x40] sm:$0xff]   ;;  %v926_v4 = vld [vmem:[#allocation2 + $0x48] sm:$0xff]   ;;  %v1013_v43 = vmov 0.0   ;;  %vm1014_vm0 = vmmov 0  }
  0x13   :  { %v923_v1 = vld [vmem:[#allocation2] sm:$0xff]   ;;  %814 = vmatprep.subr.bf16.mxu0 %v922_v0  ;;  %v927_v5 = vld [vmem:[#allocation2 + $0x8] sm:$0xff]   ;;  %v930_v8 = vld [vmem:[#allocation2 + $0x50] sm:$0xff]   ;;  %vm462_vm1 = vcmask 130048  }
  0x14   :  { %v924_v2 = vld [vmem:[#allocation2 + $0xc0] sm:$0xff]   ;;  %815 = vmatpush3.bf16.msra.mxu0 %v923_v1  ;;  %v928_v6 = vld [vmem:[#allocation2 + $0xc8] sm:$0xff]   ;;  %v931_v9 = vld [vmem:[#allocation2 + $0x10] sm:$0xff]  }
  0x15   :  { %v925_v3 = vld [vmem:[#allocation2 + $0x80] sm:$0xff]   ;;  %836 = vmatprep.subr.bf16.mxu1 %v924_v2  ;;  %816 = vmatprep.subr.bf16.mxu0 %v926_v4  ;;  %v929_v7 = vld [vmem:[#allocation2 + $0x88] sm:$0xff]   ;;  %v932_v10 = vld [vmem:[#allocation2 + $0xd0] sm:$0xff]  }
  0x16   :  { %837 = vmatpush3.bf16.msra.mxu1 %v925_v3  ;;  %v933_v11 = vld [vmem:[#allocation2 + $0x90] sm:$0xff]   ;;  %v934_v12 = vld [vmem:[#allocation2 + $0x58] sm:$0xff]   ;;  %v938_v16 = vld [vmem:[#allocation2 + $0x60] sm:$0xff]  }
  0x17   :  { %838 = vmatprep.subr.bf16.mxu1 %v928_v6  ;;  %v935_v13 = vld [vmem:[#allocation2 + $0x18] sm:$0xff]   ;;  %v939_v17 = vld [vmem:[#allocation2 + $0x20] sm:$0xff]   ;;  %v942_v20 = vld [vmem:[#allocation2 + $0x68] sm:$0xff]  }
  0x18   :  { %817 = vmatpush3.bf16.msra.mxu0 %v927_v5  ;;  %v936_v14 = vld [vmem:[#allocation2 + $0xd8] sm:$0xff]   ;;  %v940_v18 = vld [vmem:[#allocation2 + $0xe0] sm:$0xff]   ;;  %v943_v21 = vld [vmem:[#allocation2 + $0x28] sm:$0xff]  }
  0x19   :  { %818 = vmatprep.subr.bf16.mxu0 %v930_v8  ;;  %v937_v15 = vld [vmem:[#allocation2 + $0x98] sm:$0xff]   ;;  %v941_v19 = vld [vmem:[#allocation2 + $0xa0] sm:$0xff]   ;;  %v944_v22 = vld [vmem:[#allocation2 + $0xe8] sm:$0xff]  }
  0x1a   :  { %839 = vmatpush3.bf16.msra.mxu1 %v929_v7  ;;  %v945_v23 = vld [vmem:[#allocation2 + $0xa8] sm:$0xff]   ;;  %v946_v24 = vld [vmem:[#allocation2 + $0x70] sm:$0xff]   ;;  %v950_v28 = vld [vmem:[#allocation2 + $0x78] sm:$0xff]  }
  0x1b   :  { %840 = vmatprep.subr.bf16.mxu1 %v932_v10  ;;  %v947_v25 = vld [vmem:[#allocation2 + $0x30] sm:$0xff]   ;;  %v951_v29 = vld [vmem:[#allocation2 + $0x38] sm:$0xff]   ;;  %v35_v31 = vld [vmem:[%s1104_s0] sm:$0xff] }
  0x1c   :  { %819 = vmatpush3.bf16.msra.mxu0 %v931_v9  ;;  %v948_v26 = vld [vmem:[#allocation2 + $0xf0] sm:$0xff]   ;;  %v952_v30 = vld [vmem:[#allocation2 + $0xf8] sm:$0xff]   ;;  %v748_v32 = vcombine.low %v35_v31, %v35_v31  ;;  %v749_v33 = vcombine.high %v35_v31, %v35_v31  ;;  %v956_v35 = vld [vmem:[#allocation2 + $0x140] sm:$0xff]  }
  0x1d   :  { %820 = vmatprep.subr.bf16.mxu0 %v934_v12  ;;  %v949_v27 = vld [vmem:[#allocation2 + $0xb0] sm:$0xff]   ;;  %v955_v34 = vld [vmem:[#allocation2 + $0xb8] sm:$0xff]   ;;  %v36_v36 = vld [vmem:[%s1104_s0 + $0x8] sm:$0xff] }
  0x1e   :  { %841 = vmatpush3.bf16.msra.mxu1 %v933_v11  ;;  %498 = vmatprep.mubr.bf16.mxu0 %v749_v33  ;;  %v750_v37 = vcombine.low %v36_v36, %v36_v36  ;;  %v751_v38 = vcombine.high %v36_v36, %v36_v36  ;;  %v959_v39 = vld [vmem:[#allocation2 + $0x100] sm:$0xff]   ;;  %v960_v40 = vld [vmem:[#allocation2 + $0x148] sm:$0xff]   ;;  %v962_v42 = vld [vmem:[#allocation2 + $0x150] sm:$0xff]  }
  0x1f   :  { %842 = vmatprep.subr.bf16.mxu1 %v936_v14  ;;  %v961_v41 = vld [vmem:[#allocation2 + $0x108] sm:$0xff]   ;;  %v963_v44 = vld [vmem:[#allocation2 + $0x110] sm:$0xff]   ;;  %v964_v45 = vld [vmem:[#allocation2 + $0x158] sm:$0xff]  }
  0x20   :  { %821 = vmatpush3.bf16.msra.mxu0 %v935_v13  ;;  %538 = vmatprep.mubr.bf16.mxu1 %v751_v38  ;;  %v965_v46 = vld [vmem:[#allocation2 + $0x118] sm:$0xff]   ;;  %v966_v47 = vld [vmem:[#allocation2 + $0x160] sm:$0xff]   ;;  %v968_v49 = vld [vmem:[#allocation2 + $0x168] sm:$0xff]  }
  0x21   :  { %822 = vmatprep.subr.bf16.mxu0 %v938_v16  ;;  %v967_v48 = vld [vmem:[#allocation2 + $0x120] sm:$0xff]   ;;  %v37_v51 = vld [vmem:[%s1104_s0 + $0x10] sm:$0xff]  ;;  %v969_v52 = vld [vmem:[#allocation2 + $0x128] sm:$0xff]  }
  0x22   :  { %843 = vmatpush3.bf16.msra.mxu1 %v937_v15  ;;  %v974_v50 = vld [vmem:[#allocation2 + $0x180] sm:$0xff]   ;;  %v753_v53 = vcombine.high %v37_v51, %v37_v51  ;;  %v977_v54 = vld [vmem:[%s1104_s0 + $0x18] ss:$0 sps:$4 sm:$0xff]   ;;  %v970_v55 = vld [vmem:[#allocation2 + $0x170] sm:$0xff]   ;;  %v752_v59 = vcombine.low %v37_v51, %v37_v51 }
  0x23   :  { %844 = vmatprep.subr.bf16.mxu1 %v940_v18  ;;  %v971_v56 = vld [vmem:[#allocation2 + $0x130] sm:$0xff]   ;;  %v972_v57 = vld [vmem:[#allocation2 + $0x178] sm:$0xff]   ;;  %v978_v60 = vld [vmem:[%s1107_s3] sm:$0xff]  }
  0x24   :  { %823 = vmatpush3.bf16.msra.mxu0 %v939_v17  ;;  %v973_v58 = vld [vmem:[#allocation2 + $0x138] sm:$0xff]   ;;  %v979_v61 = vld [vmem:[%s1107_s3 + $0x8] sm:$0xff]   ;;  %v980_v62 = vld [vmem:[%s1107_s3 + $0x10] sm:$0xff]  }
  0x25   :  { %824 = vmatprep.subr.bf16.mxu0 %v942_v20  ;;  %v981_v63 = vld [vmem:[%s1107_s3 + $0x18] sm:$0xff]   ;;  %v982_v0 = vld [vmem:[%s1107_s3 + $0x20] sm:$0xff]   ;;  %v983_v1 = vld [vmem:[%s1107_s3 + $0x28] sm:$0xff]  }
  0x26   :  { %845 = vmatpush3.bf16.msra.mxu1 %v941_v19  ;;  %v984_v2 = vld [vmem:[%s1107_s3 + $0x30] sm:$0xff]   ;;  %v985_v3 = vld [vmem:[%s1107_s3 + $0x38] sm:$0xff]   ;;  %v747_v5 = vld [vmem:[%s1106_s2] ss:$0 sm:$0xff] }
  0x27   :  { %846 = vmatprep.subr.bf16.mxu1 %v944_v22 }
  0x28   :  { %825 = vmatpush3.bf16.msra.mxu0 %v943_v21 }
  0x29   :  { %826 = vmatprep.subr.bf16.mxu0 %v946_v24 }
  0x2a   :  { %847 = vmatpush3.bf16.msra.mxu1 %v945_v23 }
  0x2b   :  { %848 = vmatprep.subr.bf16.mxu1 %v948_v26 }
  0x2c   :  { %827 = vmatpush3.bf16.msra.mxu0 %v947_v25 }
  0x2d   :  { %828 = vmatprep.subr.bf16.mxu0 %v950_v28 }
  0x2e   :  { %849 = vmatpush3.bf16.msra.mxu1 %v949_v27 }
  0x2f   :  { %850 = vmatprep.subr.bf16.mxu1 %v952_v30  ;;  %v805_v30 = vld [vmem:[%s1108_s4] ss:$0 sm:$0xff] }
  0x30   :  { %829 = vmatpush3.bf16.msra.mxu0 %v951_v29 }
  0x31   :  { %858 = vmatprep.subr.bf16.mxu0 %v956_v35 }
  0x32   :  { %851 = vmatpush3.bf16.msra.mxu1 %v955_v34 }
  0x33   :  { %499 = vmatmul.mubr.bf16.vlgmr.msra.gmra.mrb[0].mxu0 %v748_v32  ;;  %891 = vmatprep.subr.bf16.mxu1 %v1013_v43 }
  0x34   :  { %859 = vmatpush3.bf16.msra.mxu0 %v959_v39  ;;  %578 = vmatprep.mubr.bf16.mxu0 %v753_v53 }
  0x35   :  { %539 = vmatmul.mubr.bf16.vlgmr.msra.gmra.mrb[0].mxu1 %v750_v37  ;;  %860 = vmatprep.subr.bf16.mxu0 %v960_v40 }
  0x36   :  { %893 = vmatprep.mubr.msk.bf16.mxu1 %vm1014_vm0, %v1013_v43  ;;  %892 = vmatpush3.bf16.msra.mxu1 %v974_v50 }
  0x37   :  { %897 = vmatprep.subr.bf16.mxu1 %v1013_v43 }
  0x38   :  { %861 = vmatpush3.bf16.msra.mxu0 %v961_v41 }
  0x39   :  { %862 = vmatprep.subr.bf16.mxu0 %v962_v42 }
  0x3c   :  { %863 = vmatpush3.bf16.msra.mxu0 %v963_v44 }
  0x3d   :  { %864 = vmatprep.subr.bf16.mxu0 %v964_v45  ;;  %894 = vmatmul.mubr.msk.bf16.vlgmr.msra.gmra.mrb[4].mxu1 %vm462_vm1, %v977_v54 }
  0x3e   :  { %913 = vmatprep.mubr.msk.bf16.mxu1 %vm1014_vm0, %v1013_v43  ;;  %898 = vmatpush3.bf16.msra.mxu1 %v978_v60 }
  0x3f   :  { %899 = vmatprep.subr.bf16.mxu1 %v1013_v43 }
  0x40   :  { %865 = vmatpush3.bf16.msra.mxu0 %v965_v46 }
  0x41   :  { %866 = vmatprep.subr.bf16.mxu0 %v966_v47 }
  0x42   :  { %900 = vmatpush3.bf16.msra.mxu1 %v979_v61 }
  0x43   :  { %901 = vmatprep.subr.bf16.mxu1 %v1013_v43 }
  0x44   :  { %867 = vmatpush3.bf16.msra.mxu0 %v967_v48 }
  0x45   :  { %868 = vmatprep.subr.bf16.mxu0 %v968_v49 }
  0x46   :  { %902 = vmatpush3.bf16.msra.mxu1 %v980_v62 }
  0x47   :  { %903 = vmatprep.subr.bf16.mxu1 %v1013_v43 }
  0x48   :  { %869 = vmatpush3.bf16.msra.mxu0 %v969_v52 }
  0x49   :  { %870 = vmatprep.subr.bf16.mxu0 %v970_v55 }
  0x4a   :  { %904 = vmatpush3.bf16.msra.mxu1 %v981_v63 }
  0x4b   :  { %905 = vmatprep.subr.bf16.mxu1 %v1013_v43 }
  0x4c   :  { %871 = vmatpush3.bf16.msra.mxu0 %v971_v56 }
  0x4d   :  { %872 = vmatprep.subr.bf16.mxu0 %v972_v57 }
  0x4e   :  { %906 = vmatpush3.bf16.msra.mxu1 %v982_v0 }
  0x4f   :  { %907 = vmatprep.subr.bf16.mxu1 %v1013_v43 }
  0x50   :  { %873 = vmatpush3.bf16.msra.mxu0 %v973_v58 }
  0x52   :  { %908 = vmatpush3.bf16.msra.mxu1 %v983_v1 }
  0x53   :  { %579 = vmatmul.mubr.bf16.vlgmr.msra.gmra.mrb[4].mxu0 %v752_v59  ;;  %909 = vmatprep.subr.bf16.mxu1 %v1013_v43 }
  0x56   :  { %910 = vmatpush3.bf16.msra.mxu1 %v984_v2 }
  0x57   :  { %911 = vmatprep.subr.bf16.mxu1 %v1013_v43 }
  0x5a   :  { %912 = vmatpush3.bf16.msra.mxu1 %v985_v3 }
 0x106   :  { %v830_v4 = vpop.f32.mrb[0].mxu0 }
 0x107   :  { %v831_v6 = vpop.f32.mrb[1].mxu0 }
 0x108   :  { %v832_v7 = vadd.f32 %v831_v6, %v830_v4  ;;  %v833_v8 = vpop.f32.mrb[2].mxu0  ;;  %v852_v9 = vpop.f32.mrb[0].mxu1 }
 0x109   :  { %v834_v10 = vpop.f32.mrb[3].mxu0  ;;  %v853_v11 = vpop.f32.mrb[1].mxu1 }
 0x10a   :  { %v501_v12 = vadd.f32 %v832_v7, %v747_v5  ;;  %v854_v13 = vadd.f32 %v853_v11, %v852_v9  ;;  %v855_v14 = vpop.f32.mrb[2].mxu1 }
 0x10b   :  { %v856_v15 = vpop.f32.mrb[3].mxu1 }
 0x10c   :  { %v541_v16 = vadd.f32 %v854_v13, %v501_v12 }
 0x110   :  { %v620_v17 = vpop.f32.mrb[4].mxu1 }
 0x111   :  { %v895_v18 = vpop.f32.mrb[5].mxu1 }
 0x112   :  { %v623_v19 = vpop.f32.mrb[6].mxu1 }
 0x113   :  { %v896_v20 = vpop.f32.mrb[7].mxu1 }
 0x126   :  { %v874_v21 = vpop.f32.mrb[4].mxu0 }
 0x127   :  { %v875_v22 = vpop.f32.mrb[5].mxu0 }
 0x128   :  { %v876_v23 = vadd.f32 %v875_v22, %v874_v21  ;;  %v877_v24 = vpop.f32.mrb[6].mxu0 }
 0x129   :  { %v878_v25 = vpop.f32.mrb[7].mxu0 }
 0x12a   :  { %v581_v26 = vadd.f32 %v876_v23, %v541_v16 }
 0x12c   :  { %v621_v27 = vadd.f32 %v620_v17, %v581_v26 }
 0x12e   :  { %v626_v28 = vmax.f32 %v621_v27, 0.0 }
 0x130   :  { %v627_v29 = vpack.c.bf16 %v626_v28, %v626_v28 }
 0x132   :  { %914 = vmatmul.mubr.bf16.vlgmr.msra.gmra.mrb[8].mxu1 %v627_v29 }
 0x205   :  { %v733_v31 = vpop.f32.mrb[8].mxu1 }
 0x206   :  { %v734_v32 = vadd.f32 %v805_v30, %v733_v31  ;;  %v915_v33 = vpop.f32.mrb[9].mxu1 }
 0x207   :  { %v736_v34 = vpop.f32.mrb[10].mxu1 }
 0x208   :  { %v739_v35 = vmax.f32 %v734_v32, 0.0  ;;  %v916_v36 = vpop.f32.mrb[11].mxu1 }
 0x20a   :  { %v740_v37 = vpack.c.bf16 %v739_v35, %v739_v35 }
 0x20c   :  { %741 = vst [vmem:[%s1109_s5] sm:$0xf] %v740_v37 }
 0x20d   :  { %746 = vsyncpa [#allocation3], 1 }

</bundles_post_ra>
